<compile_context>
chip_gen: v7x
topology: tpu7x:2x2x1
jax: 0.10.0
libtpu: 0.0.40
codegen_flags: <defaults>
</compile_context>

<pallas_src>
import functools

import jax
import jax.numpy as jnp
from jax import lax
from jax.experimental import pallas as pl
from jax.experimental.pallas import tpu as pltpu


def _round_up(v, m):
    return (v + m - 1) // m * m


def _sublane_multiple(dtype):
    # Rows per sublane-dense tile: f32 -> 8, bf16 -> 16, int8/fp8 -> 32.
    return 8 * (4 // jnp.dtype(dtype).itemsize)


def _pad2(a, rows, cols):
    r, c = a.shape
    if r == rows and c == cols:
        return a            # fast path: no extra HBM pass when already aligned
    return jnp.zeros((rows, cols), a.dtype).at[:r, :c].set(a)


_HAS_BUFFERED = hasattr(pl, "Buffered")


def _resident_spec(shape, buffered):
    """BlockSpec for an operand that stays VMEM-resident (constant block index)."""
    n = len(shape)
    index_map = lambda i: (0,) * n
    if buffered and _HAS_BUFFERED:
        try:
            # Constant blocks never change -> single-buffer them instead of the
            # default 2-deep pipelining (saves (Dp^2 + 2*Mp*Dp)*itemsize VMEM).
            return pl.BlockSpec(shape, index_map, pipeline_mode=pl.Buffered(1))
        except TypeError:
            pass
    return pl.BlockSpec(shape, index_map)


def memory_kernel(x_ref, wpT_ref, b_ref, keyT_ref, mem_ref,
                  out_ref, att_ref=None, *, m_valid):
    # x_ref: [TN, Dp]      wpT_ref: [Dp, Dp]   b_ref: [1, Dp] (f32)
    # keyT_ref: [Dp, Mp]   mem_ref: [Mp, Dp]
    # out_ref: [TN, Dp]    att_ref: [TN, Mp] (optional)
    x = x_ref[...]

    # x_query = tanh(x @ W^T + b): MXU matmul, f32 accumulation, tanh on EUP.
    xq = jnp.dot(x, wpT_ref[...], preferred_element_type=jnp.float32)
    xq = jnp.tanh(xq + b_ref[...].astype(jnp.float32))

    # logits = x_query @ key^T. key is pre-transposed in the wrapper so this
    # is a plain [TN,Dp] x [Dp,Mp] MXU matmul (no in-kernel transpose).
    keyT = keyT_ref[...]
    logits = jnp.dot(xq.astype(keyT.dtype), keyT,
                     preferred_element_type=jnp.float32)        # [TN, Mp]

    # Mask zero-padded memory slots (columns >= m_valid).
    mp = logits.shape[-1]
    if m_valid < mp:
        col = lax.broadcasted_iota(jnp.int32, logits.shape, 1)
        logits = jnp.where(col < m_valid, logits, -1e30)

    # Numerically-stable softmax. Exact divide: att_weight is a user-visible
    # output, so we avoid the ~1e-3 error of the approximate EUP reciprocal.
    logits = logits - jnp.max(logits, axis=-1, keepdims=True)
    p = jnp.exp(logits)
    p = p / jnp.sum(p, axis=-1, keepdims=True)

    # out = att @ memMatrix
    mem = mem_ref[...]
    out = jnp.dot(p.astype(mem.dtype), mem, preferred_element_type=jnp.float32)

    out_ref[...] = out.astype(out_ref.dtype)
    if att_ref is not None:
        att_ref[...] = p.astype(att_ref.dtype)


def memory_forward(x, w_proj, b_proj, key_matrix, mem_matrix, *,
                   block_rows=1024, return_att=True, matmul_dtype=None):
    """x: [N, D]; w_proj: [D, D] (PyTorch Linear weight, out x in); b_proj: [D];
       key_matrix / mem_matrix: [M, D].
       Returns dict(out=[N, D][, att_weight=[N, M]]).
       matmul_dtype (e.g. jnp.bfloat16) optionally lowers MXU operand precision
       (f32 accumulation kept) — useful on v5e when the model dtype is f32."""
    N, D = x.shape
    M, Dk = key_matrix.shape
    assert D == Dk == mem_matrix.shape[1] == w_proj.shape[0] == w_proj.shape[1], \
        'dimension mismatch'

    dt = x.dtype                                     # model / output dtype
    cdt = jnp.dtype(matmul_dtype) if matmul_dtype is not None else jnp.dtype(dt)
    in_isz = cdt.itemsize
    out_isz = jnp.dtype(dt).itemsize

    Dp = _round_up(D, 128)                           # lane-dense feature dim
    Mp = _round_up(M, 128)                           # lane-dense attention dim
    sub = _sublane_multiple(cdt)                     # sublane-dense row multiple

    # Row tile: as large as possible, but ensure >=2 grid steps when N allows
    # so v7x's two TensorCores both get work (no-op on v5e/v6e).
    Nr = _round_up(max(N, 1), sub)
    TN = min(block_rows, Nr)
    if Nr // TN < 2 and Nr > sub:
        TN = max(sub, _round_up(-(-N // 2), sub))

    # Generation-aware VMEM budget (~48 MiB usable on v7x, ~96 MiB v5e/v6e).
    try:
        phys_vmem = pltpu.get_tpu_info().vmem_capacity_bytes
    except Exception:
        phys_vmem = 64 * 1024 * 1024                 # conservative (v7x)
    budget = max(32 * 1024 * 1024, int(0.75 * phys_vmem))

    resident_bufs = 1 if _HAS_BUFFERED else 2

    def vmem_needed(tn):
        resident = (Dp * Dp + 8 * Dp + 2 * Mp * Dp) * in_isz * resident_bufs
        tiles = 2 * tn * Dp * in_isz + 2 * tn * Dp * out_isz
        if return_att:
            tiles += 2 * tn * Mp * out_isz
        temps = (tn * Dp + 2 * tn * Mp) * 4          # f32 intermediates
        return resident + tiles + temps

    while vmem_needed(TN) > budget and TN > sub:
        TN = max(sub, _round_up(TN // 2, sub))
    # TODO(synk): for very large D (W_proj alone exceeding the VMEM budget,
    # e.g. D>=4096 on v7x) add a contraction-tiled grid axis for the first
    # matmul instead of keeping W fully resident.

    Np = _round_up(N, TN)
    vmem_limit = int(min(budget, max(vmem_needed(TN) + (4 << 20), 32 << 20)))

    # One-time wrapper padding / casts (skipped entirely when already aligned).
    xp = _pad2(x.astype(cdt), Np, Dp)
    wpT = _pad2(w_proj.astype(cdt).T, Dp, Dp)
    bp = _pad2(b_proj.astype(jnp.float32).reshape(1, D), 1, Dp)   # bias stays f32
    keyT = _pad2(key_matrix.astype(cdt).T, Dp, Mp)                # pre-transposed
    memp = _pad2(mem_matrix.astype(cdt), Mp, Dp)

    flops = 2 * Np * Dp * Dp + 2 * Np * Dp * Mp + 2 * Np * Mp * Dp
    transcendentals = Np * Dp + Np * Mp                           # tanh + exp
    bytes_accessed = (in_isz * (Np * Dp + Dp * Dp + 2 * Mp * Dp) + 4 * Dp
                      + out_isz * (Np * Dp + (Np * Mp if return_att else 0)))

    kernel = functools.partial(memory_kernel, m_valid=M)

    out_shapes = [jax.ShapeDtypeStruct((Np, Dp), dt)]
    out_specs = [pl.BlockSpec((TN, Dp), lambda i: (i, 0))]
    if return_att:
        out_shapes.append(jax.ShapeDtypeStruct((Np, Mp), dt))
        out_specs.append(pl.BlockSpec((TN, Mp), lambda i: (i, 0)))

    def build_and_run(buffered):
        grid_spec = pltpu.PrefetchScalarGridSpec(
            num_scalar_prefetch=0,
            grid=(Np // TN,),
            in_specs=[
                pl.BlockSpec((TN, Dp), lambda i: (i, 0)),        # x (row-tiled)
                _resident_spec((Dp, Dp), buffered),              # W_proj^T
                _resident_spec((1, Dp), buffered),               # bias
                _resident_spec((Dp, Mp), buffered),              # keyMatrix^T
                _resident_spec((Mp, Dp), buffered),              # memMatrix
            ],
            out_specs=out_specs,
        )
        return pl.pallas_call(
            kernel,
            out_shape=tuple(out_shapes),
            grid_spec=grid_spec,
            compiler_params=pltpu.CompilerParams(
                dimension_semantics=("parallel",),               # shard rows across TCs
                vmem_limit_bytes=vmem_limit,
            ),
            cost_estimate=pl.CostEstimate(
                flops=flops,
                transcendentals=transcendentals,
                bytes_accessed=bytes_accessed,
            ),
        )(xp, wpT, bp, keyT, memp)

    try:
        results = build_and_run(True)
    except Exception:
        if not _HAS_BUFFERED:
            raise
        # Fall back to default double-buffered resident specs if this
        # JAX/Mosaic build rejects pipeline_mode=pl.Buffered(1).
        results = build_and_run(False)

    out_p = results[0]
    ret = dict(out=out_p if (Np == N and Dp == D) else out_p[:N, :D])
    if return_att:
        att_p = results[1]
        ret["att_weight"] = att_p if (Np == N and Mp == M) else att_p[:N, :M]
    return ret


def init_params(key, num_memory, memory_dim):
    k1, k2, k3 = jax.random.split(key, 3)
    # nn.Parameter(torch.randn(...)) -> standard normal
    mem_matrix = jax.random.normal(k1, (num_memory, memory_dim), jnp.float32)
    key_matrix = jax.random.normal(k2, (num_memory, memory_dim), jnp.float32)
    # xavier_uniform_ for the Linear weight, zero bias
    limit = jnp.sqrt(6.0 / (memory_dim + memory_dim))
    w_proj = jax.random.uniform(k3, (memory_dim, memory_dim), jnp.float32,
                                minval=-limit, maxval=limit)
    b_proj = jnp.zeros((memory_dim,), jnp.float32)
    return mem_matrix, key_matrix, w_proj, b_proj


def reference_forward(x, w_proj, b_proj, key_matrix, mem_matrix):
    xq = jnp.tanh(x @ w_proj.T + b_proj)
    att = jax.nn.softmax(xq @ key_matrix.T, axis=-1)
    out = att @ mem_matrix
    return out, att


if __name__ == "__main__":
    num_memory = 16
    memory_dim = 32
    N = 8

    root = jax.random.PRNGKey(0)
    kx, kp = jax.random.split(root)
    x = jax.random.normal(kx, (N, memory_dim), jnp.float32)
    mem_matrix, key_matrix, w_proj, b_proj = init_params(kp, num_memory, memory_dim)

    result = memory_forward(x, w_proj, b_proj, key_matrix, mem_matrix)
    out = jax.block_until_ready(result["out"])
    att = jax.block_until_ready(result["att_weight"])

    ref_out, ref_att = reference_forward(x, w_proj, b_proj, key_matrix, mem_matrix)
    assert out.shape == (N, memory_dim)
    assert att.shape == (N, num_memory)
    # Tolerance covers TPU default (bf16-pass) matmul precision in both paths.
    assert jnp.allclose(out, ref_out, atol=3e-3, rtol=3e-3)
    assert jnp.allclose(att, ref_att, atol=3e-3, rtol=3e-3)

    print("KERNEL_OK")
</pallas_src>

<mosaic_0001>
module attributes {stable_mosaic.version = 11 : i64} {
  func.func @memory_kernel(%arg0: i32, %arg1: memref<8x128xf32, #tpu.memory_space<vmem>>, %arg2: memref<128x128xf32, #tpu.memory_space<vmem>>, %arg3: memref<1x128xf32, #tpu.memory_space<vmem>>, %arg4: memref<128x128xf32, #tpu.memory_space<vmem>>, %arg5: memref<128x128xf32, #tpu.memory_space<vmem>>, %arg6: memref<8x128xf32, #tpu.memory_space<vmem>>, %arg7: memref<8x128xf32, #tpu.memory_space<vmem>>) attributes {dimension_semantics = [#tpu.dimension_semantics<parallel>], iteration_bounds = array<i64: 1>, scalar_prefetch = 0 : i64, scratch_operands = 0 : i64, tpu.core_type = #tpu.core_type<tc>, window_params = [{transform_indices = @transform_0, window_bounds = array<i64: 8, 128>}, {pipeline_mode = #tpu.pipeline_mode<synchronous>, transform_indices = @transform_1, window_bounds = array<i64: 128, 128>}, {pipeline_mode = #tpu.pipeline_mode<synchronous>, transform_indices = @transform_2, window_bounds = array<i64: 1, 128>}, {pipeline_mode = #tpu.pipeline_mode<synchronous>, transform_indices = @transform_3, window_bounds = array<i64: 128, 128>}, {pipeline_mode = #tpu.pipeline_mode<synchronous>, transform_indices = @transform_4, window_bounds = array<i64: 128, 128>}, {transform_indices = @transform_5, window_bounds = array<i64: 8, 128>}, {transform_indices = @transform_6, window_bounds = array<i64: 8, 128>}]} {
    %c0 = arith.constant 0 : index
    %c0_0 = arith.constant 0 : index
    %0 = vector.load %arg1[%c0, %c0_0] : memref<8x128xf32, #tpu.memory_space<vmem>>, vector<8x128xf32>
    %c0_1 = arith.constant 0 : index
    %c0_2 = arith.constant 0 : index
    %1 = vector.load %arg2[%c0_1, %c0_2] : memref<128x128xf32, #tpu.memory_space<vmem>>, vector<128x128xf32>
    %cst = arith.constant dense<0.000000e+00> : vector<8x128xf32>
    %2 = tpu.matmul %0, %1, %cst {dimension_numbers = #tpu.dot_dimension_numbers<[1], [0], [0], [1], [0, 0, 1, 1], [], []>} : vector<8x128xf32>, vector<128x128xf32>, vector<8x128xf32> -> vector<8x128xf32>
    %c0_3 = arith.constant 0 : index
    %c0_4 = arith.constant 0 : index
    %3 = vector.load %arg3[%c0_3, %c0_4] : memref<1x128xf32, #tpu.memory_space<vmem>>, vector<1x128xf32>
    %4 = vector.broadcast %3 : vector<1x128xf32> to vector<8x128xf32>
    %5 = arith.addf %2, %4 : vector<8x128xf32>
    %6 = math.tanh %5 : vector<8x128xf32>
    %c0_5 = arith.constant 0 : index
    %c0_6 = arith.constant 0 : index
    %7 = vector.load %arg4[%c0_5, %c0_6] : memref<128x128xf32, #tpu.memory_space<vmem>>, vector<128x128xf32>
    %cst_7 = arith.constant dense<0.000000e+00> : vector<8x128xf32>
    %8 = tpu.matmul %6, %7, %cst_7 {dimension_numbers = #tpu.dot_dimension_numbers<[1], [0], [0], [1], [0, 0, 1, 1], [], []>} : vector<8x128xf32>, vector<128x128xf32>, vector<8x128xf32> -> vector<8x128xf32>
    %9 = tpu.iota {dimensions = array<i32: 1>} : vector<8x128xi32>
    %c16_i32 = arith.constant 16 : i32
    %10 = vector.broadcast %c16_i32 : i32 to vector<8x128xi32>
    %11 = arith.cmpi slt, %9, %10 : vector<8x128xi32>
    %cst_8 = arith.constant -1.000000e+30 : f32
    %12 = vector.broadcast %cst_8 : f32 to vector<8x128xf32>
    %13 = arith.select %11, %8, %12 : vector<8x128xi1>, vector<8x128xf32>
    %cst_9 = arith.constant dense<0xFF800000> : vector<8xf32>
    %14 = vector.multi_reduction <maximumf>, %13, %cst_9 [1] : vector<8x128xf32> to vector<8xf32>
    %15 = vector.shape_cast %14 : vector<8xf32> to vector<8x1xf32>
    %16 = vector.broadcast %15 : vector<8x1xf32> to vector<8x128xf32>
    %17 = arith.subf %13, %16 : vector<8x128xf32>
    %18 = math.exp %17 : vector<8x128xf32>
    %cst_10 = arith.constant dense<0.000000e+00> : vector<8xf32>
    %19 = vector.multi_reduction <add>, %18, %cst_10 [1] : vector<8x128xf32> to vector<8xf32>
    %20 = vector.shape_cast %19 : vector<8xf32> to vector<8x1xf32>
    %21 = vector.broadcast %20 : vector<8x1xf32> to vector<8x128xf32>
    %22 = arith.divf %18, %21 : vector<8x128xf32>
    %c0_11 = arith.constant 0 : index
    %c0_12 = arith.constant 0 : index
    %23 = vector.load %arg5[%c0_11, %c0_12] : memref<128x128xf32, #tpu.memory_space<vmem>>, vector<128x128xf32>
    %cst_13 = arith.constant dense<0.000000e+00> : vector<8x128xf32>
    %24 = tpu.matmul %22, %23, %cst_13 {dimension_numbers = #tpu.dot_dimension_numbers<[1], [0], [0], [1], [0, 0, 1, 1], [], []>} : vector<8x128xf32>, vector<128x128xf32>, vector<8x128xf32> -> vector<8x128xf32>
    %c0_14 = arith.constant 0 : index
    %c0_15 = arith.constant 0 : index
    %25 = vector.load %arg6[%c0_14, %c0_15] : memref<8x128xf32, #tpu.memory_space<vmem>>, vector<8x128xf32>
    tpu.vector_store %arg6[%c0_14, %c0_15], %24 {strides = array<i32>} : memref<8x128xf32, #tpu.memory_space<vmem>>, vector<8x128xf32>,
    %c0_16 = arith.constant 0 : index
    %c0_17 = arith.constant 0 : index
    %26 = vector.load %arg7[%c0_16, %c0_17] : memref<8x128xf32, #tpu.memory_space<vmem>>, vector<8x128xf32>
    tpu.vector_store %arg7[%c0_16, %c0_17], %22 {strides = array<i32>} : memref<8x128xf32, #tpu.memory_space<vmem>>, vector<8x128xf32>,
    return
  }
  func.func @transform_0(%arg0: i32) -> (i32, i32) {
    %c0_i32 = arith.constant 0 : i32
    %c0_i32_0 = arith.constant 0 : i32
    return %arg0, %c0_i32 : i32, i32
  }
  func.func @transform_1(%arg0: i32) -> (i32, i32) {
    %c0_i32 = arith.constant 0 : i32
    %c0_i32_0 = arith.constant 0 : i32
    %c0_i32_1 = arith.constant 0 : i32
    return %c0_i32, %c0_i32_0 : i32, i32
  }
  func.func @transform_2(%arg0: i32) -> (i32, i32) {
    %c0_i32 = arith.constant 0 : i32
    %c0_i32_0 = arith.constant 0 : i32
    %c0_i32_1 = arith.constant 0 : i32
    return %c0_i32, %c0_i32_0 : i32, i32
  }
  func.func @transform_3(%arg0: i32) -> (i32, i32) {
    %c0_i32 = arith.constant 0 : i32
    %c0_i32_0 = arith.constant 0 : i32
    %c0_i32_1 = arith.constant 0 : i32
    return %c0_i32, %c0_i32_0 : i32, i32
  }
  func.func @transform_4(%arg0: i32) -> (i32, i32) {
    %c0_i32 = arith.constant 0 : i32
    %c0_i32_0 = arith.constant 0 : i32
    %c0_i32_1 = arith.constant 0 : i32
    return %c0_i32, %c0_i32_0 : i32, i32
  }
  func.func @transform_5(%arg0: i32) -> (i32, i32) {
    %c0_i32 = arith.constant 0 : i32
    %c0_i32_0 = arith.constant 0 : i32
    return %arg0, %c0_i32 : i32, i32
  }
  func.func @transform_6(%arg0: i32) -> (i32, i32) {
    %c0_i32 = arith.constant 0 : i32
    %c0_i32_0 = arith.constant 0 : i32
    return %arg0, %c0_i32 : i32, i32
  }
}

module attributes {stable_mosaic.version = 11 : i64} {
  func.func @memory_kernel(%arg0: i32, %arg1: memref<8x128xf32, #tpu.memory_space<vmem>>, %arg2: memref<128x128xf32, #tpu.memory_space<vmem>>, %arg3: memref<1x128xf32, #tpu.memory_space<vmem>>, %arg4: memref<128x128xf32, #tpu.memory_space<vmem>>, %arg5: memref<128x128xf32, #tpu.memory_space<vmem>>, %arg6: memref<8x128xf32, #tpu.memory_space<vmem>>, %arg7: memref<8x128xf32, #tpu.memory_space<vmem>>) attributes {dimension_semantics = [#tpu.dimension_semantics<parallel>], iteration_bounds = array<i64: 1>, scalar_prefetch = 0 : i64, scratch_operands = 0 : i64, tpu.core_type = #tpu.core_type<tc>, window_params = [{transform_indices = @transform_0, window_bounds = array<i64: 8, 128>}, {pipeline_mode = #tpu.pipeline_mode<synchronous>, transform_indices = @transform_1, window_bounds = array<i64: 128, 128>}, {pipeline_mode = #tpu.pipeline_mode<synchronous>, transform_indices = @transform_2, window_bounds = array<i64: 1, 128>}, {pipeline_mode = #tpu.pipeline_mode<synchronous>, transform_indices = @transform_3, window_bounds = array<i64: 128, 128>}, {pipeline_mode = #tpu.pipeline_mode<synchronous>, transform_indices = @transform_4, window_bounds = array<i64: 128, 128>}, {transform_indices = @transform_5, window_bounds = array<i64: 8, 128>}, {transform_indices = @transform_6, window_bounds = array<i64: 8, 128>}]} {
    %c0 = arith.constant 0 : index
    %c0_0 = arith.constant 0 : index
    %0 = vector.load %arg1[%c0, %c0_0] : memref<8x128xf32, #tpu.memory_space<vmem>>, vector<8x128xf32>
    %c0_1 = arith.constant 0 : index
    %c0_2 = arith.constant 0 : index
    %1 = vector.load %arg2[%c0_1, %c0_2] : memref<128x128xf32, #tpu.memory_space<vmem>>, vector<128x128xf32>
    %cst = arith.constant dense<0.000000e+00> : vector<8x128xf32>
    %2 = tpu.matmul %0, %1, %cst {dimension_numbers = #tpu.dot_dimension_numbers<[1], [0], [0], [1], [0, 0, 1, 1], [], []>} : vector<8x128xf32>, vector<128x128xf32>, vector<8x128xf32> -> vector<8x128xf32>
    %c0_3 = arith.constant 0 : index
    %c0_4 = arith.constant 0 : index
    %3 = vector.load %arg3[%c0_3, %c0_4] : memref<1x128xf32, #tpu.memory_space<vmem>>, vector<1x128xf32>
    %4 = vector.broadcast %3 : vector<1x128xf32> to vector<8x128xf32>
    %5 = arith.addf %2, %4 : vector<8x128xf32>
    %6 = math.tanh %5 : vector<8x128xf32>
    %c0_5 = arith.constant 0 : index
    %c0_6 = arith.constant 0 : index
    %7 = vector.load %arg4[%c0_5, %c0_6] : memref<128x128xf32, #tpu.memory_space<vmem>>, vector<128x128xf32>
    %cst_7 = arith.constant dense<0.000000e+00> : vector<8x128xf32>
    %8 = tpu.matmul %6, %7, %cst_7 {dimension_numbers = #tpu.dot_dimension_numbers<[1], [0], [0], [1], [0, 0, 1, 1], [], []>} : vector<8x128xf32>, vector<128x128xf32>, vector<8x128xf32> -> vector<8x128xf32>
    %9 = tpu.iota {dimensions = array<i32: 1>} : vector<8x128xi32>
    %c16_i32 = arith.constant 16 : i32
    %10 = vector.broadcast %c16_i32 : i32 to vector<8x128xi32>
    %11 = arith.cmpi slt, %9, %10 : vector<8x128xi32>
    %cst_8 = arith.constant -1.000000e+30 : f32
    %12 = vector.broadcast %cst_8 : f32 to vector<8x128xf32>
    %13 = arith.select %11, %8, %12 : vector<8x128xi1>, vector<8x128xf32>
    %cst_9 = arith.constant dense<0xFF800000> : vector<8xf32>
    %14 = vector.multi_reduction <maximumf>, %13, %cst_9 [1] : vector<8x128xf32> to vector<8xf32>
    %15 = vector.shape_cast %14 : vector<8xf32> to vector<8x1xf32>
    %16 = vector.broadcast %15 : vector<8x1xf32> to vector<8x128xf32>
    %17 = arith.subf %13, %16 : vector<8x128xf32>
    %18 = math.exp %17 : vector<8x128xf32>
    %cst_10 = arith.constant dense<0.000000e+00> : vector<8xf32>
    %19 = vector.multi_reduction <add>, %18, %cst_10 [1] : vector<8x128xf32> to vector<8xf32>
    %20 = vector.shape_cast %19 : vector<8xf32> to vector<8x1xf32>
    %21 = vector.broadcast %20 : vector<8x1xf32> to vector<8x128xf32>
    %22 = arith.divf %18, %21 : vector<8x128xf32>
    %c0_11 = arith.constant 0 : index
    %c0_12 = arith.constant 0 : index
    %23 = vector.load %arg5[%c0_11, %c0_12] : memref<128x128xf32, #tpu.memory_space<vmem>>, vector<128x128xf32>
    %cst_13 = arith.constant dense<0.000000e+00> : vector<8x128xf32>
    %24 = tpu.matmul %22, %23, %cst_13 {dimension_numbers = #tpu.dot_dimension_numbers<[1], [0], [0], [1], [0, 0, 1, 1], [], []>} : vector<8x128xf32>, vector<128x128xf32>, vector<8x128xf32> -> vector<8x128xf32>
    %c0_14 = arith.constant 0 : index
    %c0_15 = arith.constant 0 : index
    %25 = vector.load %arg6[%c0_14, %c0_15] : memref<8x128xf32, #tpu.memory_space<vmem>>, vector<8x128xf32>
    tpu.vector_store %arg6[%c0_14, %c0_15], %24 {strides = array<i32>} : memref<8x128xf32, #tpu.memory_space<vmem>>, vector<8x128xf32>,
    %c0_16 = arith.constant 0 : index
    %c0_17 = arith.constant 0 : index
    %26 = vector.load %arg7[%c0_16, %c0_17] : memref<8x128xf32, #tpu.memory_space<vmem>>, vector<8x128xf32>
    tpu.vector_store %arg7[%c0_16, %c0_17], %22 {strides = array<i32>} : memref<8x128xf32, #tpu.memory_space<vmem>>, vector<8x128xf32>,
    return
  }
  func.func @transform_0(%arg0: i32) -> (i32, i32) {
    %c0_i32 = arith.constant 0 : i32
    %c0_i32_0 = arith.constant 0 : i32
    return %arg0, %c0_i32 : i32, i32
  }
  func.func @transform_1(%arg0: i32) -> (i32, i32) {
    %c0_i32 = arith.constant 0 : i32
    %c0_i32_0 = arith.constant 0 : i32
    %c0_i32_1 = arith.constant 0 : i32
    return %c0_i32, %c0_i32_0 : i32, i32
  }
  func.func @transform_2(%arg0: i32) -> (i32, i32) {
    %c0_i32 = arith.constant 0 : i32
    %c0_i32_0 = arith.constant 0 : i32
    %c0_i32_1 = arith.constant 0 : i32
    return %c0_i32, %c0_i32_0 : i32, i32
  }
  func.func @transform_3(%arg0: i32) -> (i32, i32) {
    %c0_i32 = arith.constant 0 : i32
    %c0_i32_0 = arith.constant 0 : i32
    %c0_i32_1 = arith.constant 0 : i32
    return %c0_i32, %c0_i32_0 : i32, i32
  }
  func.func @transform_4(%arg0: i32) -> (i32, i32) {
    %c0_i32 = arith.constant 0 : i32
    %c0_i32_0 = arith.constant 0 : i32
    %c0_i32_1 = arith.constant 0 : i32
    return %c0_i32, %c0_i32_0 : i32, i32
  }
  func.func @transform_5(%arg0: i32) -> (i32, i32) {
    %c0_i32 = arith.constant 0 : i32
    %c0_i32_0 = arith.constant 0 : i32
    return %arg0, %c0_i32 : i32, i32
  }
  func.func @transform_6(%arg0: i32) -> (i32, i32) {
    %c0_i32 = arith.constant 0 : i32
    %c0_i32_0 = arith.constant 0 : i32
    return %arg0, %c0_i32 : i32, i32
  }
}

</mosaic_0001>

<bundles_post_ra>
// kernel: tpu_custom_call.1
= control target key start
LH: loop header
LB: loop body
LE: loop exit
PB: predicated region body
PF: predicated region fallthrough
CT: control target
= control target key end

     0   :  { %12 = vsyncpa [#allocation3], 0  ;;  %s938_s0 = inlined_call_operand.hbm [shape: f32[8,128], index: 0, kind: input, shape index: {}]   ;;  %s939_s1 = inlined_call_operand.hbm [shape: f32[128,128], index: 1, kind: input, shape index: {}]   ;;  %s940_s2 = inlined_call_operand.vmem [shape: f32[1,128], index: 2, kind: input, shape index: {}]   ;;  %s941_s3 = inlined_call_operand.hbm [shape: f32[128,128], index: 3, kind: input, shape index: {}]   ;;  %s942_s4 = inlined_call_operand.hbm [shape: f32[128,128], index: 4, kind: input, shape index: {}]   ;;  %s943_s5 = inlined_call_operand.hbm [shape: f32[8,128], index: 5, kind: output, shape index: {0}]   ;;  %s944_s6 = inlined_call_operand.hbm [shape: f32[8,128], index: 6, kind: output, shape index: {1}]  }
   0x1   :  { %13 = vsyncpa [#allocation6], 0 }
   0x2   :  { %14 = vsyncpa [#allocation9], 0 }
   0x3   :  { %15 = vsyncpa [#allocation4], 0 }
   0x4   :  { %16 = vsyncpa [#allocation12], 0  ;;  %s778_s21 = smov [#allocation5]   ;;  %s636_s25 = scalar_lea.hbm %s939_s1, 2048 }
   0x5   :  { %s32_s22 = sshll.u32 %s778_s21, 4  ;;  %p637_p0 = scmp.ne.s32.totalorder %s939_s1, %s636_s25  ;;  %s33_s22 = int_to_ptr.vmem [resolvable:$true] %s32_s22 }
   0x6   :  { %p640_p1 = scmp.lt.u32.totalorder %s636_s25, %s939_s1 }
   0x8   :  { %p642_p2 = pnand %p640_p1, %p637_p0 }
   0xa   :  { %645 = shalt.err (!%p642_p2)
}
   0xb   :  { %s646_s30 = scalar_lea.vmem %s33_s22, 2048  ;;  %p651_p4 = scmp.lt.s32.totalorder %s33_s22, %s33_s22 }
   0xc   :  { %p647_p3 = scmp.ne.s32.totalorder %s33_s22, %s646_s30  ;;  %p652_p5 = scmp.lt.s32.totalorder %s646_s30, %s646_s30 }
   0xe   :  { %p653_p6 = por %p652_p5, %p651_p4 }
  0x10   :  { %p654_p7 = pnand %p653_p6, %p647_p3 }
  0x12   :  { %657 = shalt.err (!%p654_p7)
}
  0x13   :  { %s779_s7 = smov 128   ;;  %s780_s8 = smov 8  }
  0x14   :  { %38 = dma.hbm_to_vmem [thread:$0]  %s939_s1, 2048, %s33_s22, [#allocation6], %s779_s7, %s779_s7, %s780_s8  }
  0x15   :  { %s781_s11 = smov [#allocation2]   ;;  %s782_s13 = smov [#allocation7]  }
  0x16   :  { %s23_s12 = sshll.u32 %s781_s11, 4  ;;  %s46_s14 = sshll.u32 %s782_s13, 4  ;;  %s24_s12 = int_to_ptr.vmem [resolvable:$true] %s23_s12  ;;  %s47_s14 = int_to_ptr.vmem [resolvable:$true] %s46_s14 }
  0x17   :  { %s658_s17 = scalar_lea.hbm %s938_s0, 128 }
  0x18   :  { %p659_p8 = scmp.ne.s32.totalorder %s938_s0, %s658_s17  ;;  %p662_p9 = scmp.lt.u32.totalorder %s658_s17, %s938_s0 }
  0x1a   :  { %p664_p10 = pnand %p662_p9, %p659_p8 }
  0x1c   :  { %667 = shalt.err (!%p664_p10)
}
  0x1d   :  { %s668_s1 = scalar_lea.vmem %s24_s12, 128  ;;  %p673_p12 = scmp.lt.s32.totalorder %s24_s12, %s24_s12 }
  0x1e   :  { %p669_p11 = scmp.ne.s32.totalorder %s24_s12, %s668_s1  ;;  %p674_p13 = scmp.lt.s32.totalorder %s668_s1, %s668_s1 }
  0x20   :  { %p675_p0 = por %p674_p13, %p673_p12 }
  0x22   :  { %p676_p1 = pnand %p675_p0, %p669_p11 }
  0x24   :  { %679 = shalt.err (!%p676_p1)
}
  0x25   :  { %26 = dma.hbm_to_vmem [thread:$0]  %s938_s0, 128, %s24_s12, [#allocation3]  }
  0x26   :  { %s680_s26 = scalar_lea.hbm %s941_s3, 2048 }
  0x27   :  { %p681_p2 = scmp.ne.s32.totalorder %s941_s3, %s680_s26  ;;  %p684_p3 = scmp.lt.u32.totalorder %s680_s26, %s941_s3 }
  0x29   :  { %p686_p4 = pnand %p684_p3, %p681_p2 }
  0x2b   :  { %689 = shalt.err (!%p686_p4)
}
  0x2c   :  { %s690_s9 = scalar_lea.vmem %s47_s14, 2048  ;;  %p695_p6 = scmp.lt.s32.totalorder %s47_s14, %s47_s14 }
  0x2d   :  { %p691_p5 = scmp.ne.s32.totalorder %s47_s14, %s690_s9  ;;  %p696_p7 = scmp.lt.s32.totalorder %s690_s9, %s690_s9 }
  0x2f   :  { %p697_p8 = por %p696_p7, %p695_p6 }
  0x31   :  { %p698_p9 = pnand %p697_p8, %p691_p5 }
  0x33   :  { %701 = shalt.err (!%p698_p9)
}
  0x34   :  { %52 = dma.hbm_to_vmem [thread:$0]  %s941_s3, 2048, %s47_s14, [#allocation6], %s779_s7, %s779_s7, %s780_s8  }
  0x35   :  { %s783_s11 = smov [#allocation8]   ;;  %s702_s16 = scalar_lea.hbm %s942_s4, 2048 }
  0x36   :  { %s58_s12 = sshll.u32 %s783_s11, 4  ;;  %p703_p10 = scmp.ne.s32.totalorder %s942_s4, %s702_s16  ;;  %s59_s12 = int_to_ptr.vmem [resolvable:$true] %s58_s12 }
  0x37   :  { %p706_p11 = scmp.lt.u32.totalorder %s702_s16, %s942_s4 }
  0x39   :  { %p708_p12 = pnand %p706_p11, %p703_p10 }
  0x3b   :  { %711 = shalt.err (!%p708_p12)
}
  0x3c   :  { %s712_s21 = scalar_lea.vmem %s59_s12, 2048  ;;  %p717_p0 = scmp.lt.s32.totalorder %s59_s12, %s59_s12 }
  0x3d   :  { %p713_p13 = scmp.ne.s32.totalorder %s59_s12, %s712_s21  ;;  %p718_p1 = scmp.lt.s32.totalorder %s712_s21, %s712_s21 }
  0x3f   :  { %p719_p2 = por %p718_p1, %p717_p0 }
  0x41   :  { %p720_p3 = pnand %p719_p2, %p713_p13 }
  0x43   :  { %723 = shalt.err (!%p720_p3)
}
  0x44   :  { %64 = dma.hbm_to_vmem [thread:$0]  %s942_s4, 2048, %s59_s12, [#allocation9], %s779_s7, %s779_s7, %s780_s8  }
  0x45   :  { %768 = dma.done.wait [#allocation3], 128  }
  0x46   :  { %769 = vsyncadd [#allocation3], 4294967168 }
  0x47   :  { %770 = dma.done.wait [#allocation6], 4096  }
  0x48   :  { %771 = vsyncadd [#allocation6], 4294963200 }
  0x49   :  { %772 = dma.done.wait [#allocation9], 2048  }
  0x4a   :  { %773 = vsyncadd [#allocation9], 4294965248  ;;  %v784_v0 = vmov 0.0|0.0   ;;  %vm785_vm0 = vmmov 0   ;;  %v786_v1 = vmov 0.0   ;;  %v78_v2 = vld [vmem:[#allocation5] sm:$0xff]  ;;  %v258_v56 = vlaneseq }
  0x4b   :  { %547 = vmatprep.subr.bf16.mxu0 %v784_v0  ;;  %474 = vmatprep.mubr.msk.f32.mxu0 %vm785_vm0, %v786_v1  ;;  %v79_v3 = vld [vmem:[#allocation5 + $0x8] sm:$0xff]  ;;  %v80_v4 = vld [vmem:[#allocation5 + $0x10] sm:$0xff]  ;;  %v81_v6 = vld [vmem:[#allocation5 + $0x18] sm:$0xff] }
  0x4c   :  { %571 = vmatprep.subr.bf16.mxu1 %v784_v0  ;;  %509 = vmatprep.mubr.msk.f32.mxu1 %vm785_vm0, %v786_v1  ;;  %v548_v5 = vpack.c.bf16 %v79_v3, %v78_v2  ;;  %v551_v7 = vpack.c.bf16 %v81_v6, %v80_v4  ;;  %v82_v8 = vld [vmem:[#allocation5 + $0x20] sm:$0xff]  ;;  %v83_v9 = vld [vmem:[#allocation5 + $0x28] sm:$0xff]  ;;  %v174_v12 = vld [vmem:[#allocation7 + $0x10] sm:$0xff]  ;;  %v259_v57 = vand.u32 127, %v258_v56 }
  0x4d   :  { %v172_v10 = vld [vmem:[#allocation7] sm:$0xff]  ;;  %v173_v11 = vld [vmem:[#allocation7 + $0x8] sm:$0xff]  ;;  %v175_v13 = vld [vmem:[#allocation7 + $0x18] sm:$0xff]  ;;  %v554_v14 = vpack.c.bf16 %v83_v9, %v82_v8 }
  0x4e   :  { %549 = vmatpush3.bf16.msra.mxu0 %v548_v5  ;;  %v572_v15 = vpack.c.bf16 %v173_v11, %v172_v10  ;;  %v84_v16 = vld [vmem:[#allocation5 + $0x30] sm:$0xff]  ;;  %v85_v17 = vld [vmem:[#allocation5 + $0x38] sm:$0xff]  ;;  %v575_v18 = vpack.c.bf16 %v175_v13, %v174_v12  ;;  %v176_v19 = vld [vmem:[#allocation7 + $0x20] sm:$0xff]  ;;  %vm260_vm1 = vcmp.lt.s32.totalorder %v259_v57, 16 }
  0x4f   :  { %550 = vmatprep.subr.bf16.mxu0 %v784_v0  ;;  %v177_v20 = vld [vmem:[#allocation7 + $0x28] sm:$0xff]  ;;  %v557_v21 = vpack.c.bf16 %v85_v17, %v84_v16  ;;  %v86_v22 = vld [vmem:[#allocation5 + $0x40] sm:$0xff]  ;;  %v178_v25 = vld [vmem:[#allocation7 + $0x30] sm:$0xff] }
  0x50   :  { %573 = vmatpush3.bf16.msra.mxu1 %v572_v15  ;;  %v87_v23 = vld [vmem:[#allocation5 + $0x48] sm:$0xff]  ;;  %v578_v24 = vpack.c.bf16 %v177_v20, %v176_v19  ;;  %v179_v26 = vld [vmem:[#allocation7 + $0x38] sm:$0xff]  ;;  %v88_v28 = vld [vmem:[#allocation5 + $0x50] sm:$0xff] }
  0x51   :  { %574 = vmatprep.subr.bf16.mxu1 %v784_v0  ;;  %v560_v27 = vpack.c.bf16 %v87_v23, %v86_v22  ;;  %v89_v29 = vld [vmem:[#allocation5 + $0x58] sm:$0xff]  ;;  %v581_v30 = vpack.c.bf16 %v179_v26, %v178_v25  ;;  %v180_v31 = vld [vmem:[#allocation7 + $0x40] sm:$0xff]  ;;  %v181_v32 = vld [vmem:[#allocation7 + $0x48] sm:$0xff] }
  0x52   :  { %552 = vmatpush3.bf16.msra.mxu0 %v551_v7  ;;  %v563_v33 = vpack.c.bf16 %v89_v29, %v88_v28  ;;  %v90_v34 = vld [vmem:[#allocation5 + $0x60] sm:$0xff]  ;;  %v91_v35 = vld [vmem:[#allocation5 + $0x68] sm:$0xff]  ;;  %v584_v36 = vpack.c.bf16 %v181_v32, %v180_v31  ;;  %v92_v38 = vld [vmem:[#allocation5 + $0x70] sm:$0xff] }
  0x53   :  { %553 = vmatprep.subr.bf16.mxu0 %v784_v0  ;;  %v566_v37 = vpack.c.bf16 %v91_v35, %v90_v34  ;;  %v93_v39 = vld [vmem:[#allocation5 + $0x78] sm:$0xff]  ;;  %v182_v42 = vld [vmem:[#allocation7 + $0x50] sm:$0xff]  ;;  %v184_v45 = vld [vmem:[#allocation7 + $0x60] sm:$0xff] }
  0x54   :  { %576 = vmatpush3.bf16.msra.mxu1 %v575_v18  ;;  %v569_v40 = vpack.c.bf16 %v93_v39, %v92_v38  ;;  %v77_v41 = vld [vmem:[#allocation2] sm:$0xff]  ;;  %v185_v46 = vld [vmem:[#allocation7 + $0x68] sm:$0xff]  ;;  %v186_v48 = vld [vmem:[#allocation7 + $0x70] sm:$0xff] }
  0x55   :  { %577 = vmatprep.subr.bf16.mxu1 %v784_v0  ;;  %v183_v43 = vld [vmem:[#allocation7 + $0x58] sm:$0xff]  ;;  %v590_v47 = vpack.c.bf16 %v185_v46, %v184_v45  ;;  %v271_v61 = vld [vmem:[#allocation8] sm:$0xff]  ;;  %v272_v62 = vld [vmem:[#allocation8 + $0x8] sm:$0xff] }
  0x56   :  { %555 = vmatpush3.bf16.msra.mxu0 %v554_v14  ;;  %v587_v44 = vpack.c.bf16 %v183_v43, %v182_v42  ;;  %v187_v49 = vld [vmem:[#allocation7 + $0x78] sm:$0xff]  ;;  %v273_v63 = vld [vmem:[#allocation8 + $0x10] sm:$0xff]  ;;  %v275_v4 = vld [vmem:[#allocation8 + $0x20] sm:$0xff] }
  0x57   :  { %556 = vmatprep.subr.bf16.mxu0 %v784_v0  ;;  %v593_v50 = vpack.c.bf16 %v187_v49, %v186_v48  ;;  %v390_v51 = vld [vmem:[%s940_s2] ss:$0 sm:$0xff]  ;;  %v276_v5 = vld [vmem:[#allocation8 + $0x28] sm:$0xff]  ;;  %v277_v7 = vld [vmem:[#allocation8 + $0x30] sm:$0xff]  ;;  %s787_s2 = smov [#allocation11]  }
  0x58   :  { %579 = vmatpush3.bf16.msra.mxu1 %v578_v24  ;;  %v274_v2 = vld [vmem:[#allocation8 + $0x18] sm:$0xff]  ;;  %v602_v6 = vpack.c.bf16 %v276_v5, %v275_v4  ;;  %v279_v10 = vld [vmem:[#allocation8 + $0x40] sm:$0xff]  ;;  %v280_v11 = vld [vmem:[#allocation8 + $0x48] sm:$0xff]  ;;  %s375_s8 = sshll.u32 %s787_s2, 4  ;;  %s376_s8 = int_to_ptr.vmem [resolvable:$true] %s375_s8 }
  0x59   :  { %580 = vmatprep.subr.bf16.mxu1 %v784_v0  ;;  %v599_v3 = vpack.c.bf16 %v274_v2, %v273_v63  ;;  %v278_v8 = vld [vmem:[#allocation8 + $0x38] sm:$0xff]  ;;  %v608_v12 = vpack.c.bf16 %v280_v11, %v279_v10  ;;  %v281_v17 = vld [vmem:[#allocation8 + $0x50] sm:$0xff]  ;;  %v283_v20 = vld [vmem:[#allocation8 + $0x60] sm:$0xff]  ;;  %s724_s1 = scalar_lea.vmem %s376_s8, 128  ;;  %p729_p5 = scmp.lt.s32.totalorder %s376_s8, %s376_s8 }
  0x5a   :  { %558 = vmatpush3.bf16.msra.mxu0 %v557_v21  ;;  %v605_v9 = vpack.c.bf16 %v278_v8, %v277_v7  ;;  %v282_v18 = vld [vmem:[#allocation8 + $0x58] sm:$0xff]  ;;  %v284_v21 = vld [vmem:[#allocation8 + $0x68] sm:$0xff]  ;;  %v285_v23 = vld [vmem:[#allocation8 + $0x70] sm:$0xff]  ;;  %p725_p4 = scmp.ne.s32.totalorder %s376_s8, %s724_s1  ;;  %p730_p6 = scmp.lt.s32.totalorder %s724_s1, %s724_s1 }
  0x5b   :  { %559 = vmatprep.subr.bf16.mxu0 %v784_v0  ;;  %v611_v19 = vpack.c.bf16 %v282_v18, %v281_v17  ;;  %v614_v22 = vpack.c.bf16 %v284_v21, %v283_v20  ;;  %v286_v24 = vld [vmem:[#allocation8 + $0x78] sm:$0xff] }
  0x5c   :  { %582 = vmatpush3.bf16.msra.mxu1 %v581_v30  ;;  %v617_v25 = vpack.c.bf16 %v286_v24, %v285_v23  ;;  %p731_p7 = por %p730_p6, %p729_p5 }
  0x5d   :  { %583 = vmatprep.subr.bf16.mxu1 %v784_v0 }
  0x5e   :  { %561 = vmatpush3.bf16.msra.mxu0 %v560_v27  ;;  %p732_p8 = pnand %p731_p7, %p725_p4 }
  0x5f   :  { %562 = vmatprep.subr.bf16.mxu0 %v784_v0 }
  0x60   :  { %585 = vmatpush3.bf16.msra.mxu1 %v584_v36 }
  0x61   :  { %586 = vmatprep.subr.bf16.mxu1 %v784_v0 }
  0x62   :  { %564 = vmatpush3.bf16.msra.mxu0 %v563_v33 }
  0x63   :  { %565 = vmatprep.subr.bf16.mxu0 %v784_v0 }
  0x64   :  { %588 = vmatpush3.bf16.msra.mxu1 %v587_v44 }
  0x65   :  { %589 = vmatprep.subr.bf16.mxu1 %v784_v0 }
  0x66   :  { %567 = vmatpush3.bf16.msra.mxu0 %v566_v37 }
  0x67   :  { %568 = vmatprep.subr.bf16.mxu0 %v784_v0 }
  0x68   :  { %591 = vmatpush3.bf16.msra.mxu1 %v590_v47 }
  0x69   :  { %592 = vmatprep.subr.bf16.mxu1 %v784_v0 }
  0x6a   :  { %570 = vmatpush3.bf16.msra.mxu0 %v569_v40 }
  0x6b   :  { %595 = vmatprep.subr.bf16.mxu0 %v784_v0 }
  0x6c   :  { %594 = vmatpush3.bf16.msra.mxu1 %v593_v50 }
  0x6d   :  { %475 = vmatmul.mubr.f32.vlgmr.msra.gmra.mrb[0].mxu0 %v77_v41 }
  0x6e   :  { %544 = vmatprep.mubr.msk.f32.mxu0 %vm785_vm0, %v786_v1  ;;  %v596_v1 = vpack.c.bf16 %v272_v62, %v271_v61 }
  0x70   :  { %597 = vmatpush3.bf16.msra.mxu0 %v596_v1 }
  0x71   :  { %598 = vmatprep.subr.bf16.mxu0 %v784_v0 }
  0x74   :  { %600 = vmatpush3.bf16.msra.mxu0 %v599_v3 }
  0x75   :  { %601 = vmatprep.subr.bf16.mxu0 %v784_v0 }
  0x78   :  { %603 = vmatpush3.bf16.msra.mxu0 %v602_v6 }
  0x79   :  { %604 = vmatprep.subr.bf16.mxu0 %v784_v0 }
  0x7c   :  { %606 = vmatpush3.bf16.msra.mxu0 %v605_v9 }
  0x7d   :  { %607 = vmatprep.subr.bf16.mxu0 %v784_v0 }
  0x80   :  { %609 = vmatpush3.bf16.msra.mxu0 %v608_v12 }
  0x81   :  { %610 = vmatprep.subr.bf16.mxu0 %v784_v0 }
  0x84   :  { %612 = vmatpush3.bf16.msra.mxu0 %v611_v19 }
  0x85   :  { %613 = vmatprep.subr.bf16.mxu0 %v784_v0 }
  0x88   :  { %615 = vmatpush3.bf16.msra.mxu0 %v614_v22 }
  0x89   :  { %616 = vmatprep.subr.bf16.mxu0 %v784_v0 }
  0x8c   :  { %618 = vmatpush3.bf16.msra.mxu0 %v617_v25 }
 0x140   :  { %v167_v52 = vpop.f32.mrb[0].mxu0 }
 0x141   :  { %v168_v53 = vadd.f32 %v390_v51, %v167_v52  ;;  %v476_v54 = vpop.f32.mrb[1].mxu0 }
 0x143   :  { %630 = vtanh.f32 %v168_v53 }
 0x14d   :  { %v631_v55 = vpop.eup %630 }
 0x14e   :  { %510 = vmatmul.mubr.f32.vlgmr.msra.gmra.mrb[0].mxu1 %v631_v55 }
 0x221   :  { %v254_v58 = vpop.f32.mrb[0].mxu1 }
 0x222   :  { %v511_v59 = vpop.f32.mrb[1].mxu1  ;;  %v261_v60 = vsel %vm260_vm1, %v254_v58, -1e+30 }
 0x223   :  { %262 = vmax.xlane.f32.xlu0 %v261_v60 }
 0x2b0   :  { %v263_v13 = vpop.xlane.xlu0 %262 }
 0x2b1   :  { %v264_v14 = vsub.f32 %v261_v60, %v263_v13 }
 0x2b3   :  { %v265_v15 = vmul.f32 1.442695, %v264_v14 }
 0x2b5   :  { %632 = vpow2.f32 %v265_v15 }
 0x2bf   :  { %v633_v16 = vpop.eup %632 }
 0x2c0   :  { %267 = vadd.xlane.f32.xlu0 %v633_v16 }
 0x34d   :  { %v268_v26 = vpop.xlane.xlu0 %267 }
 0x34e   :  { %634 = vrcp.f32 %v268_v26 }
 0x358   :  { %v635_v27 = vpop.eup %634 }
 0x359   :  { %v270_v28 = vmul.f32 %v635_v27, %v633_v16 }
 0x35b   :  { %545 = vmatmul.mubr.f32.vlgmr.msra.gmra.mrb[2].mxu0 %v270_v28  ;;  %358 = vst [vmem:[#allocation11] sm:$0xff] %v270_v28 }
 0x35c   :  { %735 = shalt.err (!%p732_p8)
}
 0x35d   :  { %s736_s24 = scalar_lea.hbm %s944_s6, 128 }
 0x35e   :  { %p737_p9 = scmp.ne.s32.totalorder %s944_s6, %s736_s24  ;;  %p740_p10 = scmp.lt.u32.totalorder %s736_s24, %s944_s6 }
 0x360   :  { %p742_p11 = pnand %p740_p10, %p737_p9 }
 0x362   :  { %745 = shalt.err (!%p742_p11)
}
 0x363   :  { %378 = dma.vmem_to_hbm [thread:$0]  %s376_s8, 128, %s944_s6, [#allocation12]  }
 0x364   :  { %s788_s9 = smov [#allocation10]  }
 0x365   :  { %s365_s0 = sshll.u32 %s788_s9, 4  ;;  %s366_s0 = int_to_ptr.vmem [resolvable:$true] %s365_s0 }
 0x366   :  { %s746_s10 = scalar_lea.vmem %s366_s0, 128  ;;  %p751_p13 = scmp.lt.s32.totalorder %s366_s0, %s366_s0 }
 0x367   :  { %p747_p12 = scmp.ne.s32.totalorder %s366_s0, %s746_s10  ;;  %p752_p0 = scmp.lt.s32.totalorder %s746_s10, %s746_s10 }
 0x369   :  { %p753_p1 = por %p752_p0, %p751_p13 }
 0x36b   :  { %p754_p2 = pnand %p753_p1, %p747_p12 }
 0x42e   :  { %v353_v0 = vpop.f32.mrb[2].mxu0 }
 0x42f   :  { %357 = vst [vmem:[#allocation10] sm:$0xff] %v353_v0  ;;  %v546_v29 = vpop.f32.mrb[3].mxu0 }
 0x430   :  { %757 = shalt.err (!%p754_p2)
}
 0x431   :  { %s758_s13 = scalar_lea.hbm %s943_s5, 128 }
 0x432   :  { %p759_p3 = scmp.ne.s32.totalorder %s943_s5, %s758_s13  ;;  %p762_p4 = scmp.lt.u32.totalorder %s758_s13, %s943_s5 }
 0x434   :  { %p764_p5 = pnand %p762_p4, %p759_p3 }
 0x436   :  { %767 = shalt.err (!%p764_p5)
}
 0x437   :  { %368 = dma.vmem_to_hbm [thread:$0]  %s366_s0, 128, %s943_s5, [#allocation4]  }
 0x438   :  { %774 = dma.done.wait [#allocation4], 128  }
 0x439   :  { %775 = vsyncadd [#allocation4], 4294967168 }
 0x43a   :  { %776 = dma.done.wait [#allocation12], 128  }
 0x43b   :  { %777 = vsyncadd [#allocation12], 4294967168 }
 0x43c   :  { %385 = vsyncpa [#allocation3], 1 }
 0x43d   :  { %386 = vsyncpa [#allocation6], 1 }
 0x43e   :  { %387 = vsyncpa [#allocation9], 1 }
 0x43f   :  { %388 = vsyncpa [#allocation4], 1 }
 0x440   :  { %389 = vsyncpa [#allocation12], 1 }

// kernel: tpu_custom_call.1
= control target key start
LH: loop header
LB: loop body
LE: loop exit
PB: predicated region body
PF: predicated region fallthrough
CT: control target
= control target key end

     0   :  { %12 = vsyncpa [#allocation3], 0  ;;  %s938_s0 = inlined_call_operand.hbm [shape: f32[8,128], index: 0, kind: input, shape index: {}]   ;;  %s939_s1 = inlined_call_operand.hbm [shape: f32[128,128], index: 1, kind: input, shape index: {}]   ;;  %s940_s2 = inlined_call_operand.vmem [shape: f32[1,128], index: 2, kind: input, shape index: {}]   ;;  %s941_s3 = inlined_call_operand.hbm [shape: f32[128,128], index: 3, kind: input, shape index: {}]   ;;  %s942_s4 = inlined_call_operand.hbm [shape: f32[128,128], index: 4, kind: input, shape index: {}]   ;;  %s943_s5 = inlined_call_operand.hbm [shape: f32[8,128], index: 5, kind: output, shape index: {0}]   ;;  %s944_s6 = inlined_call_operand.hbm [shape: f32[8,128], index: 6, kind: output, shape index: {1}]  }
   0x1   :  { %13 = vsyncpa [#allocation6], 0 }
   0x2   :  { %14 = vsyncpa [#allocation9], 0 }
   0x3   :  { %15 = vsyncpa [#allocation4], 0 }
   0x4   :  { %16 = vsyncpa [#allocation12], 0  ;;  %s778_s21 = smov [#allocation5]   ;;  %s636_s25 = scalar_lea.hbm %s939_s1, 2048 }
   0x5   :  { %s32_s22 = sshll.u32 %s778_s21, 4  ;;  %p637_p0 = scmp.ne.s32.totalorder %s939_s1, %s636_s25  ;;  %s33_s22 = int_to_ptr.vmem [resolvable:$true] %s32_s22 }
   0x6   :  { %p640_p1 = scmp.lt.u32.totalorder %s636_s25, %s939_s1 }
   0x8   :  { %p642_p2 = pnand %p640_p1, %p637_p0 }
   0xa   :  { %645 = shalt.err (!%p642_p2)
}
   0xb   :  { %s646_s30 = scalar_lea.vmem %s33_s22, 2048  ;;  %p651_p4 = scmp.lt.s32.totalorder %s33_s22, %s33_s22 }
   0xc   :  { %p647_p3 = scmp.ne.s32.totalorder %s33_s22, %s646_s30  ;;  %p652_p5 = scmp.lt.s32.totalorder %s646_s30, %s646_s30 }
   0xe   :  { %p653_p6 = por %p652_p5, %p651_p4 }
  0x10   :  { %p654_p7 = pnand %p653_p6, %p647_p3 }
  0x12   :  { %657 = shalt.err (!%p654_p7)
}
  0x13   :  { %s779_s7 = smov 128   ;;  %s780_s8 = smov 8  }
  0x14   :  { %38 = dma.hbm_to_vmem [thread:$0]  %s939_s1, 2048, %s33_s22, [#allocation6], %s779_s7, %s779_s7, %s780_s8  }
  0x15   :  { %s781_s11 = smov [#allocation2]   ;;  %s782_s13 = smov [#allocation7]  }
  0x16   :  { %s23_s12 = sshll.u32 %s781_s11, 4  ;;  %s46_s14 = sshll.u32 %s782_s13, 4  ;;  %s24_s12 = int_to_ptr.vmem [resolvable:$true] %s23_s12  ;;  %s47_s14 = int_to_ptr.vmem [resolvable:$true] %s46_s14 }
  0x17   :  { %s658_s17 = scalar_lea.hbm %s938_s0, 128 }
  0x18   :  { %p659_p8 = scmp.ne.s32.totalorder %s938_s0, %s658_s17  ;;  %p662_p9 = scmp.lt.u32.totalorder %s658_s17, %s938_s0 }
  0x1a   :  { %p664_p10 = pnand %p662_p9, %p659_p8 }
  0x1c   :  { %667 = shalt.err (!%p664_p10)
}
  0x1d   :  { %s668_s1 = scalar_lea.vmem %s24_s12, 128  ;;  %p673_p12 = scmp.lt.s32.totalorder %s24_s12, %s24_s12 }
  0x1e   :  { %p669_p11 = scmp.ne.s32.totalorder %s24_s12, %s668_s1  ;;  %p674_p13 = scmp.lt.s32.totalorder %s668_s1, %s668_s1 }
  0x20   :  { %p675_p0 = por %p674_p13, %p673_p12 }
  0x22   :  { %p676_p1 = pnand %p675_p0, %p669_p11 }
  0x24   :  { %679 = shalt.err (!%p676_p1)
}
  0x25   :  { %26 = dma.hbm_to_vmem [thread:$0]  %s938_s0, 128, %s24_s12, [#allocation3]  }
  0x26   :  { %s680_s26 = scalar_lea.hbm %s941_s3, 2048 }
  0x27   :  { %p681_p2 = scmp.ne.s32.totalorder %s941_s3, %s680_s26  ;;  %p684_p3 = scmp.lt.u32.totalorder %s680_s26, %s941_s3 }
  0x29   :  { %p686_p4 = pnand %p684_p3, %p681_p2 }
  0x2b   :  { %689 = shalt.err (!%p686_p4)
}
  0x2c   :  { %s690_s9 = scalar_lea.vmem %s47_s14, 2048  ;;  %p695_p6 = scmp.lt.s32.totalorder %s47_s14, %s47_s14 }
  0x2d   :  { %p691_p5 = scmp.ne.s32.totalorder %s47_s14, %s690_s9  ;;  %p696_p7 = scmp.lt.s32.totalorder %s690_s9, %s690_s9 }
  0x2f   :  { %p697_p8 = por %p696_p7, %p695_p6 }
  0x31   :  { %p698_p9 = pnand %p697_p8, %p691_p5 }
  0x33   :  { %701 = shalt.err (!%p698_p9)
}
  0x34   :  { %52 = dma.hbm_to_vmem [thread:$0]  %s941_s3, 2048, %s47_s14, [#allocation6], %s779_s7, %s779_s7, %s780_s8  }
  0x35   :  { %s783_s11 = smov [#allocation8]   ;;  %s702_s16 = scalar_lea.hbm %s942_s4, 2048 }
  0x36   :  { %s58_s12 = sshll.u32 %s783_s11, 4  ;;  %p703_p10 = scmp.ne.s32.totalorder %s942_s4, %s702_s16  ;;  %s59_s12 = int_to_ptr.vmem [resolvable:$true] %s58_s12 }
  0x37   :  { %p706_p11 = scmp.lt.u32.totalorder %s702_s16, %s942_s4 }
  0x39   :  { %p708_p12 = pnand %p706_p11, %p703_p10 }
  0x3b   :  { %711 = shalt.err (!%p708_p12)
}
  0x3c   :  { %s712_s21 = scalar_lea.vmem %s59_s12, 2048  ;;  %p717_p0 = scmp.lt.s32.totalorder %s59_s12, %s59_s12 }
  0x3d   :  { %p713_p13 = scmp.ne.s32.totalorder %s59_s12, %s712_s21  ;;  %p718_p1 = scmp.lt.s32.totalorder %s712_s21, %s712_s21 }
  0x3f   :  { %p719_p2 = por %p718_p1, %p717_p0 }
  0x41   :  { %p720_p3 = pnand %p719_p2, %p713_p13 }
  0x43   :  { %723 = shalt.err (!%p720_p3)
}
  0x44   :  { %64 = dma.hbm_to_vmem [thread:$0]  %s942_s4, 2048, %s59_s12, [#allocation9], %s779_s7, %s779_s7, %s780_s8  }
  0x45   :  { %768 = dma.done.wait [#allocation3], 128  }
  0x46   :  { %769 = vsyncadd [#allocation3], 4294967168 }
  0x47   :  { %770 = dma.done.wait [#allocation6], 4096  }
  0x48   :  { %771 = vsyncadd [#allocation6], 4294963200 }
  0x49   :  { %772 = dma.done.wait [#allocation9], 2048  }
  0x4a   :  { %773 = vsyncadd [#allocation9], 4294965248  ;;  %v784_v0 = vmov 0.0|0.0   ;;  %vm785_vm0 = vmmov 0   ;;  %v786_v1 = vmov 0.0   ;;  %v78_v2 = vld [vmem:[#allocation5] sm:$0xff]  ;;  %v258_v56 = vlaneseq }
  0x4b   :  { %547 = vmatprep.subr.bf16.mxu0 %v784_v0  ;;  %474 = vmatprep.mubr.msk.f32.mxu0 %vm785_vm0, %v786_v1  ;;  %v79_v3 = vld [vmem:[#allocation5 + $0x8] sm:$0xff]  ;;  %v80_v4 = vld [vmem:[#allocation5 + $0x10] sm:$0xff]  ;;  %v81_v6 = vld [vmem:[#allocation5 + $0x18] sm:$0xff] }
  0x4c   :  { %571 = vmatprep.subr.bf16.mxu1 %v784_v0  ;;  %509 = vmatprep.mubr.msk.f32.mxu1 %vm785_vm0, %v786_v1  ;;  %v548_v5 = vpack.c.bf16 %v79_v3, %v78_v2  ;;  %v551_v7 = vpack.c.bf16 %v81_v6, %v80_v4  ;;  %v82_v8 = vld [vmem:[#allocation5 + $0x20] sm:$0xff]  ;;  %v83_v9 = vld [vmem:[#allocation5 + $0x28] sm:$0xff]  ;;  %v174_v12 = vld [vmem:[#allocation7 + $0x10] sm:$0xff]  ;;  %v259_v57 = vand.u32 127, %v258_v56 }
  0x4d   :  { %v172_v10 = vld [vmem:[#allocation7] sm:$0xff]  ;;  %v173_v11 = vld [vmem:[#allocation7 + $0x8] sm:$0xff]  ;;  %v175_v13 = vld [vmem:[#allocation7 + $0x18] sm:$0xff]  ;;  %v554_v14 = vpack.c.bf16 %v83_v9, %v82_v8 }
  0x4e   :  { %549 = vmatpush3.bf16.msra.mxu0 %v548_v5  ;;  %v572_v15 = vpack.c.bf16 %v173_v11, %v172_v10  ;;  %v84_v16 = vld [vmem:[#allocation5 + $0x30] sm:$0xff]  ;;  %v85_v17 = vld [vmem:[#allocation5 + $0x38] sm:$0xff]  ;;  %v575_v18 = vpack.c.bf16 %v175_v13, %v174_v12  ;;  %v176_v19 = vld [vmem:[#allocation7 + $0x20] sm:$0xff]  ;;  %vm260_vm1 = vcmp.lt.s32.totalorder %v259_v57, 16 }
  0x4f   :  { %550 = vmatprep.subr.bf16.mxu0 %v784_v0  ;;  %v177_v20 = vld [vmem:[#allocation7 + $0x28] sm:$0xff]  ;;  %v557_v21 = vpack.c.bf16 %v85_v17, %v84_v16  ;;  %v86_v22 = vld [vmem:[#allocation5 + $0x40] sm:$0xff]  ;;  %v178_v25 = vld [vmem:[#allocation7 + $0x30] sm:$0xff] }
  0x50   :  { %573 = vmatpush3.bf16.msra.mxu1 %v572_v15  ;;  %v87_v23 = vld [vmem:[#allocation5 + $0x48] sm:$0xff]  ;;  %v578_v24 = vpack.c.bf16 %v177_v20, %v176_v19  ;;  %v179_v26 = vld [vmem:[#allocation7 + $0x38] sm:$0xff]  ;;  %v88_v28 = vld [vmem:[#allocation5 + $0x50] sm:$0xff] }
  0x51   :  { %574 = vmatprep.subr.bf16.mxu1 %v784_v0  ;;  %v560_v27 = vpack.c.bf16 %v87_v23, %v86_v22  ;;  %v89_v29 = vld [vmem:[#allocation5 + $0x58] sm:$0xff]  ;;  %v581_v30 = vpack.c.bf16 %v179_v26, %v178_v25  ;;  %v180_v31 = vld [vmem:[#allocation7 + $0x40] sm:$0xff]  ;;  %v181_v32 = vld [vmem:[#allocation7 + $0x48] sm:$0xff] }
  0x52   :  { %552 = vmatpush3.bf16.msra.mxu0 %v551_v7  ;;  %v563_v33 = vpack.c.bf16 %v89_v29, %v88_v28  ;;  %v90_v34 = vld [vmem:[#allocation5 + $0x60] sm:$0xff]  ;;  %v91_v35 = vld [vmem:[#allocation5 + $0x68] sm:$0xff]  ;;  %v584_v36 = vpack.c.bf16 %v181_v32, %v180_v31  ;;  %v92_v38 = vld [vmem:[#allocation5 + $0x70] sm:$0xff] }
  0x53   :  { %553 = vmatprep.subr.bf16.mxu0 %v784_v0  ;;  %v566_v37 = vpack.c.bf16 %v91_v35, %v90_v34  ;;  %v93_v39 = vld [vmem:[#allocation5 + $0x78] sm:$0xff]  ;;  %v182_v42 = vld [vmem:[#allocation7 + $0x50] sm:$0xff]  ;;  %v184_v45 = vld [vmem:[#allocation7 + $0x60] sm:$0xff] }
  0x54   :  { %576 = vmatpush3.bf16.msra.mxu1 %v575_v18  ;;  %v569_v40 = vpack.c.bf16 %v93_v39, %v92_v38  ;;  %v77_v41 = vld [vmem:[#allocation2] sm:$0xff]  ;;  %v185_v46 = vld [vmem:[#allocation7 + $0x68] sm:$0xff]  ;;  %v186_v48 = vld [vmem:[#allocation7 + $0x70] sm:$0xff] }
  0x55   :  { %577 = vmatprep.subr.bf16.mxu1 %v784_v0  ;;  %v183_v43 = vld [vmem:[#allocation7 + $0x58] sm:$0xff]  ;;  %v590_v47 = vpack.c.bf16 %v185_v46, %v184_v45  ;;  %v271_v61 = vld [vmem:[#allocation8] sm:$0xff]  ;;  %v272_v62 = vld [vmem:[#allocation8 + $0x8] sm:$0xff] }
  0x56   :  { %555 = vmatpush3.bf16.msra.mxu0 %v554_v14  ;;  %v587_v44 = vpack.c.bf16 %v183_v43, %v182_v42  ;;  %v187_v49 = vld [vmem:[#allocation7 + $0x78] sm:$0xff]  ;;  %v273_v63 = vld [vmem:[#allocation8 + $0x10] sm:$0xff]  ;;  %v275_v4 = vld [vmem:[#allocation8 + $0x20] sm:$0xff] }
  0x57   :  { %556 = vmatprep.subr.bf16.mxu0 %v784_v0  ;;  %v593_v50 = vpack.c.bf16 %v187_v49, %v186_v48  ;;  %v390_v51 = vld [vmem:[%s940_s2] ss:$0 sm:$0xff]  ;;  %v276_v5 = vld [vmem:[#allocation8 + $0x28] sm:$0xff]  ;;  %v277_v7 = vld [vmem:[#allocation8 + $0x30] sm:$0xff]  ;;  %s787_s2 = smov [#allocation11]  }
  0x58   :  { %579 = vmatpush3.bf16.msra.mxu1 %v578_v24  ;;  %v274_v2 = vld [vmem:[#allocation8 + $0x18] sm:$0xff]  ;;  %v602_v6 = vpack.c.bf16 %v276_v5, %v275_v4  ;;  %v279_v10 = vld [vmem:[#allocation8 + $0x40] sm:$0xff]  ;;  %v280_v11 = vld [vmem:[#allocation8 + $0x48] sm:$0xff]  ;;  %s375_s8 = sshll.u32 %s787_s2, 4  ;;  %s376_s8 = int_to_ptr.vmem [resolvable:$true] %s375_s8 }
  0x59   :  { %580 = vmatprep.subr.bf16.mxu1 %v784_v0  ;;  %v599_v3 = vpack.c.bf16 %v274_v2, %v273_v63  ;;  %v278_v8 = vld [vmem:[#allocation8 + $0x38] sm:$0xff]  ;;  %v608_v12 = vpack.c.bf16 %v280_v11, %v279_v10  ;;  %v281_v17 = vld [vmem:[#allocation8 + $0x50] sm:$0xff]  ;;  %v283_v20 = vld [vmem:[#allocation8 + $0x60] sm:$0xff]  ;;  %s724_s1 = scalar_lea.vmem %s376_s8, 128  ;;  %p729_p5 = scmp.lt.s32.totalorder %s376_s8, %s376_s8 }
  0x5a   :  { %558 = vmatpush3.bf16.msra.mxu0 %v557_v21  ;;  %v605_v9 = vpack.c.bf16 %v278_v8, %v277_v7  ;;  %v282_v18 = vld [vmem:[#allocation8 + $0x58] sm:$0xff]  ;;  %v284_v21 = vld [vmem:[#allocation8 + $0x68] sm:$0xff]  ;;  %v285_v23 = vld [vmem:[#allocation8 + $0x70] sm:$0xff]  ;;  %p725_p4 = scmp.ne.s32.totalorder %s376_s8, %s724_s1  ;;  %p730_p6 = scmp.lt.s32.totalorder %s724_s1, %s724_s1 }
  0x5b   :  { %559 = vmatprep.subr.bf16.mxu0 %v784_v0  ;;  %v611_v19 = vpack.c.bf16 %v282_v18, %v281_v17  ;;  %v614_v22 = vpack.c.bf16 %v284_v21, %v283_v20  ;;  %v286_v24 = vld [vmem:[#allocation8 + $0x78] sm:$0xff] }
  0x5c   :  { %582 = vmatpush3.bf16.msra.mxu1 %v581_v30  ;;  %v617_v25 = vpack.c.bf16 %v286_v24, %v285_v23  ;;  %p731_p7 = por %p730_p6, %p729_p5 }
  0x5d   :  { %583 = vmatprep.subr.bf16.mxu1 %v784_v0 }
  0x5e   :  { %561 = vmatpush3.bf16.msra.mxu0 %v560_v27  ;;  %p732_p8 = pnand %p731_p7, %p725_p4 }
  0x5f   :  { %562 = vmatprep.subr.bf16.mxu0 %v784_v0 }
  0x60   :  { %585 = vmatpush3.bf16.msra.mxu1 %v584_v36 }
  0x61   :  { %586 = vmatprep.subr.bf16.mxu1 %v784_v0 }
  0x62   :  { %564 = vmatpush3.bf16.msra.mxu0 %v563_v33 }
  0x63   :  { %565 = vmatprep.subr.bf16.mxu0 %v784_v0 }
  0x64   :  { %588 = vmatpush3.bf16.msra.mxu1 %v587_v44 }
  0x65   :  { %589 = vmatprep.subr.bf16.mxu1 %v784_v0 }
  0x66   :  { %567 = vmatpush3.bf16.msra.mxu0 %v566_v37 }
  0x67   :  { %568 = vmatprep.subr.bf16.mxu0 %v784_v0 }
  0x68   :  { %591 = vmatpush3.bf16.msra.mxu1 %v590_v47 }
  0x69   :  { %592 = vmatprep.subr.bf16.mxu1 %v784_v0 }
  0x6a   :  { %570 = vmatpush3.bf16.msra.mxu0 %v569_v40 }
  0x6b   :  { %595 = vmatprep.subr.bf16.mxu0 %v784_v0 }
  0x6c   :  { %594 = vmatpush3.bf16.msra.mxu1 %v593_v50 }
  0x6d   :  { %475 = vmatmul.mubr.f32.vlgmr.msra.gmra.mrb[0].mxu0 %v77_v41 }
  0x6e   :  { %544 = vmatprep.mubr.msk.f32.mxu0 %vm785_vm0, %v786_v1  ;;  %v596_v1 = vpack.c.bf16 %v272_v62, %v271_v61 }
  0x70   :  { %597 = vmatpush3.bf16.msra.mxu0 %v596_v1 }
  0x71   :  { %598 = vmatprep.subr.bf16.mxu0 %v784_v0 }
  0x74   :  { %600 = vmatpush3.bf16.msra.mxu0 %v599_v3 }
  0x75   :  { %601 = vmatprep.subr.bf16.mxu0 %v784_v0 }
  0x78   :  { %603 = vmatpush3.bf16.msra.mxu0 %v602_v6 }
  0x79   :  { %604 = vmatprep.subr.bf16.mxu0 %v784_v0 }
  0x7c   :  { %606 = vmatpush3.bf16.msra.mxu0 %v605_v9 }
  0x7d   :  { %607 = vmatprep.subr.bf16.mxu0 %v784_v0 }
  0x80   :  { %609 = vmatpush3.bf16.msra.mxu0 %v608_v12 }
  0x81   :  { %610 = vmatprep.subr.bf16.mxu0 %v784_v0 }
  0x84   :  { %612 = vmatpush3.bf16.msra.mxu0 %v611_v19 }
  0x85   :  { %613 = vmatprep.subr.bf16.mxu0 %v784_v0 }
  0x88   :  { %615 = vmatpush3.bf16.msra.mxu0 %v614_v22 }
  0x89   :  { %616 = vmatprep.subr.bf16.mxu0 %v784_v0 }
  0x8c   :  { %618 = vmatpush3.bf16.msra.mxu0 %v617_v25 }
 0x140   :  { %v167_v52 = vpop.f32.mrb[0].mxu0 }
 0x141   :  { %v168_v53 = vadd.f32 %v390_v51, %v167_v52  ;;  %v476_v54 = vpop.f32.mrb[1].mxu0 }
 0x143   :  { %630 = vtanh.f32 %v168_v53 }
 0x14d   :  { %v631_v55 = vpop.eup %630 }
 0x14e   :  { %510 = vmatmul.mubr.f32.vlgmr.msra.gmra.mrb[0].mxu1 %v631_v55 }
 0x221   :  { %v254_v58 = vpop.f32.mrb[0].mxu1 }
 0x222   :  { %v511_v59 = vpop.f32.mrb[1].mxu1  ;;  %v261_v60 = vsel %vm260_vm1, %v254_v58, -1e+30 }
 0x223   :  { %262 = vmax.xlane.f32.xlu0 %v261_v60 }
 0x2b0   :  { %v263_v13 = vpop.xlane.xlu0 %262 }
 0x2b1   :  { %v264_v14 = vsub.f32 %v261_v60, %v263_v13 }
 0x2b3   :  { %v265_v15 = vmul.f32 1.442695, %v264_v14 }
 0x2b5   :  { %632 = vpow2.f32 %v265_v15 }
 0x2bf   :  { %v633_v16 = vpop.eup %632 }
 0x2c0   :  { %267 = vadd.xlane.f32.xlu0 %v633_v16 }
 0x34d   :  { %v268_v26 = vpop.xlane.xlu0 %267 }
 0x34e   :  { %634 = vrcp.f32 %v268_v26 }
 0x358   :  { %v635_v27 = vpop.eup %634 }
 0x359   :  { %v270_v28 = vmul.f32 %v635_v27, %v633_v16 }
 0x35b   :  { %545 = vmatmul.mubr.f32.vlgmr.msra.gmra.mrb[2].mxu0 %v270_v28  ;;  %358 = vst [vmem:[#allocation11] sm:$0xff] %v270_v28 }
 0x35c   :  { %735 = shalt.err (!%p732_p8)
}
 0x35d   :  { %s736_s24 = scalar_lea.hbm %s944_s6, 128 }
 0x35e   :  { %p737_p9 = scmp.ne.s32.totalorder %s944_s6, %s736_s24  ;;  %p740_p10 = scmp.lt.u32.totalorder %s736_s24, %s944_s6 }
 0x360   :  { %p742_p11 = pnand %p740_p10, %p737_p9 }
 0x362   :  { %745 = shalt.err (!%p742_p11)
}
 0x363   :  { %378 = dma.vmem_to_hbm [thread:$0]  %s376_s8, 128, %s944_s6, [#allocation12]  }
 0x364   :  { %s788_s9 = smov [#allocation10]  }
 0x365   :  { %s365_s0 = sshll.u32 %s788_s9, 4  ;;  %s366_s0 = int_to_ptr.vmem [resolvable:$true] %s365_s0 }
 0x366   :  { %s746_s10 = scalar_lea.vmem %s366_s0, 128  ;;  %p751_p13 = scmp.lt.s32.totalorder %s366_s0, %s366_s0 }
 0x367   :  { %p747_p12 = scmp.ne.s32.totalorder %s366_s0, %s746_s10  ;;  %p752_p0 = scmp.lt.s32.totalorder %s746_s10, %s746_s10 }
 0x369   :  { %p753_p1 = por %p752_p0, %p751_p13 }
 0x36b   :  { %p754_p2 = pnand %p753_p1, %p747_p12 }
 0x42e   :  { %v353_v0 = vpop.f32.mrb[2].mxu0 }
 0x42f   :  { %357 = vst [vmem:[#allocation10] sm:$0xff] %v353_v0  ;;  %v546_v29 = vpop.f32.mrb[3].mxu0 }
 0x430   :  { %757 = shalt.err (!%p754_p2)
}
 0x431   :  { %s758_s13 = scalar_lea.hbm %s943_s5, 128 }
 0x432   :  { %p759_p3 = scmp.ne.s32.totalorder %s943_s5, %s758_s13  ;;  %p762_p4 = scmp.lt.u32.totalorder %s758_s13, %s943_s5 }
 0x434   :  { %p764_p5 = pnand %p762_p4, %p759_p3 }
 0x436   :  { %767 = shalt.err (!%p764_p5)
}
 0x437   :  { %368 = dma.vmem_to_hbm [thread:$0]  %s366_s0, 128, %s943_s5, [#allocation4]  }
 0x438   :  { %774 = dma.done.wait [#allocation4], 128  }
 0x439   :  { %775 = vsyncadd [#allocation4], 4294967168 }
 0x43a   :  { %776 = dma.done.wait [#allocation12], 128  }
 0x43b   :  { %777 = vsyncadd [#allocation12], 4294967168 }
 0x43c   :  { %385 = vsyncpa [#allocation3], 1 }
 0x43d   :  { %386 = vsyncpa [#allocation6], 1 }
 0x43e   :  { %387 = vsyncpa [#allocation9], 1 }
 0x43f   :  { %388 = vsyncpa [#allocation4], 1 }
 0x440   :  { %389 = vsyncpa [#allocation12], 1 }

</bundles_post_ra>
